<compile_context>
chip_gen: v5e
topology: v5e:2x2
jax: 0.10.0
libtpu: 0.0.40
codegen_flags: <defaults>
</compile_context>

<pallas_src>
import functools

import jax
import jax.numpy as jnp
from jax.experimental import pallas as pl
from jax.experimental.pallas import tpu as pltpu


def _round_up(a: int, m: int) -> int:
    return (a + m - 1) // m * m


def _residual_kernel(seed_ref, x_ref, w_ref, b_ref, ab_ref, o_ref, *,
                     eps: float, p: float):
    # x_ref: (TM, D) row tile (f32), w_ref: (D, D) bf16, b_ref: (1, D) f32,
    # ab_ref: SMEM (1, 2) f32 holding [alpha, beta].
    x = x_ref[...].astype(jnp.float32)
    tm, d = x_ref.shape  # static block shape

    # ---- LayerNorm (scalar affine, unbiased std like torch.std) ----
    # One-pass moments: two back-to-back lane reductions, then fused normalize.
    inv_d = 1.0 / float(d)
    s1 = jnp.sum(x, axis=-1, keepdims=True)
    s2 = jnp.sum(x * x, axis=-1, keepdims=True)
    mean = s1 * inv_d
    var_biased = jnp.maximum(s2 * inv_d - mean * mean, 0.0)
    var_unbiased = var_biased * (float(d) / float(d - 1))
    std = jnp.sqrt(var_unbiased)

    alpha = ab_ref[0, 0]
    beta = ab_ref[0, 1]
    inv = 1.0 / (std + eps)          # eps added to std, matching the module
    y = (alpha * inv) * (x - mean) + beta

    # ---- sublayer: dense (D -> D) on the MXU, bf16 operands / f32 accum ----
    z = jnp.dot(y.astype(jnp.bfloat16), w_ref[...],
                preferred_element_type=jnp.float32)
    z = z + b_ref[...].astype(jnp.float32)

    # ---- dropout (inverted, training semantics) ----
    if p >= 1.0:
        z = jnp.zeros_like(z)
    elif p > 0.0:
        # Stateless counter-based PRNG: hash(global element index ^ seed).
        seed = seed_ref[0]
        row = (jax.lax.broadcasted_iota(jnp.int32, z.shape, 0)
               + pl.program_id(0) * tm)
        col = jax.lax.broadcasted_iota(jnp.int32, z.shape, 1)
        gid = row * d + col                       # wraps for huge tensors: fine for hashing
        h = (gid ^ seed).astype(jnp.uint32)
        # murmur3 fmix32
        h = h ^ (h >> jnp.uint32(16))
        h = h * jnp.uint32(0x85EBCA6B)
        h = h ^ (h >> jnp.uint32(13))
        h = h * jnp.uint32(0xC2B2AE35)
        h = h ^ (h >> jnp.uint32(16))
        # top 24 bits -> uniform in [0, 1)
        u = (h >> jnp.uint32(8)).astype(jnp.float32) * jnp.float32(1.0 / 16777216.0)
        keep = u >= jnp.float32(p)
        z = jnp.where(keep, z * jnp.float32(1.0 / (1.0 - p)), 0.0)

    # ---- residual add ----
    o_ref[...] = (x + z).astype(o_ref.dtype)


def residual_connection(x, w, b, alpha, beta, *, dropout_p: float,
                        eps: float = 1e-6, seed: int = 0, tile_rows: int = 512):
    """x: (B, S, D) float32.  Returns x + dropout(linear(layernorm(x)))."""
    B, S, D = x.shape
    R = B * S
    x2 = x.reshape(R, D)

    # Effective row tile: multiple of 8 (f32 sublane), no bigger than the data.
    tm = min(tile_rows, _round_up(R, 8))
    tm = max(8, _round_up(tm, 8))
    R_pad = _round_up(R, tm)
    if R_pad != R:
        x2 = jnp.pad(x2, ((0, R_pad - R), (0, 0)))

    # Weights in bf16 for the MXU fast path (pre-cast once; no-op if already bf16).
    w_bf = w if w.dtype == jnp.bfloat16 else w.astype(jnp.bfloat16)
    b2 = b.reshape(1, D).astype(jnp.float32)
    ab = jnp.stack([alpha.reshape(()), beta.reshape(())]).reshape(1, 2).astype(jnp.float32)
    seed_arr = jnp.array([seed], dtype=jnp.int32)

    kernel = functools.partial(_residual_kernel, eps=float(eps), p=float(dropout_p))

    # VMEM budget: double-buffered x + out tiles (f32) + resident bf16 W + bias.
    # TODO(synk): for very large D on v7x (64 MiB VMEM) add an N-tiling grid
    # axis for W instead of holding the full (D, D) block resident.
    vmem_bytes = 2 * 2 * tm * D * 4 + D * D * 2 + 2 * D * 4 + (2 << 20)
    vmem_limit = int(min(max(vmem_bytes, 32 * 1024 * 1024), 100 * 1024 * 1024))

    out2 = pl.pallas_call(
        kernel,
        out_shape=jax.ShapeDtypeStruct((R_pad, D), x.dtype),
        grid_spec=pltpu.PrefetchScalarGridSpec(
            num_scalar_prefetch=1,                       # seed lands in SMEM
            grid=(R_pad // tm,),
            in_specs=[
                pl.BlockSpec((tm, D), lambda i, seed: (i, 0)),   # x rows
                pl.BlockSpec((D, D), lambda i, seed: (0, 0)),    # W (bf16, resident)
                pl.BlockSpec((1, D), lambda i, seed: (0, 0)),    # bias
                pl.BlockSpec(memory_space=pltpu.SMEM),           # [alpha, beta]
            ],
            out_specs=pl.BlockSpec((tm, D), lambda i, seed: (i, 0)),
        ),
        compiler_params=pltpu.CompilerParams(
            dimension_semantics=("parallel",),
            vmem_limit_bytes=vmem_limit,
        ),
    )(seed_arr, x2, w_bf, b2, ab)

    if R_pad != R:
        out2 = out2[:R]
    return out2.reshape(B, S, D)


def _reference_no_dropout(x, w, b, alpha, beta, eps=1e-6):
    # Matches module semantics (unbiased std, eps added to std) and uses the
    # same bf16 matmul operands as the kernel so tolerances stay tight.
    mean = jnp.mean(x, axis=-1, keepdims=True)
    std = jnp.std(x, axis=-1, keepdims=True, ddof=1)
    y = alpha * (x - mean) / (std + eps) + beta
    z = jnp.einsum("bsd,de->bse", y.astype(jnp.bfloat16), w.astype(jnp.bfloat16),
                   preferred_element_type=jnp.float32) + b
    return x + z


if __name__ == "__main__":
    key = jax.random.PRNGKey(0)
    kx, kw, kb = jax.random.split(key, 3)

    B, S, D = 2, 8, 128
    x = jax.random.normal(kx, (B, S, D), dtype=jnp.float32)

    # Deterministic parameter init (LayerNorm: alpha=1, beta=0; sublayer dense).
    alpha = jnp.ones((1,), dtype=jnp.float32)
    beta = jnp.zeros((1,), dtype=jnp.float32)
    w = (jax.random.normal(kw, (D, D), dtype=jnp.float32) * (1.0 / jnp.sqrt(D))
         ).astype(jnp.bfloat16)                      # pre-cast weights to bf16
    b = jax.random.normal(kb, (D,), dtype=jnp.float32) * 0.02

    # Correctness check with dropout disabled (dropout == identity).
    out_nodrop = residual_connection(x, w, b, alpha, beta, dropout_p=0.0)
    ref = _reference_no_dropout(x, w, b, alpha, beta)
    assert jnp.allclose(out_nodrop, ref, atol=2e-2, rtol=2e-2), "mismatch vs reference"

    # Run with the configured dropout rate (training semantics, deterministic seed).
    out = residual_connection(x, w, b, alpha, beta, dropout_p=0.1, seed=1234)
    jax.block_until_ready(out)
    assert out.shape == (B, S, D)
    assert bool(jnp.all(jnp.isfinite(out)))
    print("KERNEL_OK")
</pallas_src>

<mosaic_0001>
module attributes {stable_mosaic.version = 11 : i64} {
  func.func @_residual_kernel(%arg0: i32, %arg1: memref<1xi32, #tpu.memory_space<smem>>, %arg2: memref<16x128xf32, #tpu.memory_space<vmem>>, %arg3: memref<128x128xbf16, #tpu.memory_space<vmem>>, %arg4: memref<1x128xf32, #tpu.memory_space<vmem>>, %arg5: memref<1x2xf32, #tpu.memory_space<smem>>, %arg6: memref<16x128xf32, #tpu.memory_space<vmem>>) attributes {dimension_semantics = [#tpu.dimension_semantics<parallel>], iteration_bounds = array<i64: 1>, scalar_prefetch = 1 : i64, scratch_operands = 0 : i64, tpu.core_type = #tpu.core_type<tc>, window_params = [{transform_indices = @transform_0, window_bounds = array<i64: 16, 128>}, {pipeline_mode = #tpu.pipeline_mode<synchronous>, transform_indices = @transform_1, window_bounds = array<i64: 128, 128>}, {pipeline_mode = #tpu.pipeline_mode<synchronous>, transform_indices = @transform_2, window_bounds = array<i64: 1, 128>}, {transform_indices = @transform_3, window_bounds = array<i64: 1, 2>}, {transform_indices = @transform_4, window_bounds = array<i64: 16, 128>}]} {
    %c0 = arith.constant 0 : index
    %c0_0 = arith.constant 0 : index
    %0 = vector.load %arg2[%c0, %c0_0] : memref<16x128xf32, #tpu.memory_space<vmem>>, vector<16x128xf32>
    %cst = arith.constant dense<0.000000e+00> : vector<16xf32>
    %1 = vector.multi_reduction <add>, %0, %cst [1] : vector<16x128xf32> to vector<16xf32>
    %2 = vector.shape_cast %1 : vector<16xf32> to vector<16x1xf32>
    %3 = arith.mulf %0, %0 : vector<16x128xf32>
    %cst_1 = arith.constant dense<0.000000e+00> : vector<16xf32>
    %4 = vector.multi_reduction <add>, %3, %cst_1 [1] : vector<16x128xf32> to vector<16xf32>
    %5 = vector.shape_cast %4 : vector<16xf32> to vector<16x1xf32>
    %cst_2 = arith.constant 7.812500e-03 : f32
    %6 = vector.broadcast %cst_2 : f32 to vector<16x1xf32>
    %7 = arith.mulf %2, %6 : vector<16x1xf32>
    %cst_3 = arith.constant 7.812500e-03 : f32
    %8 = vector.broadcast %cst_3 : f32 to vector<16x1xf32>
    %9 = arith.mulf %5, %8 : vector<16x1xf32>
    %10 = arith.mulf %7, %7 : vector<16x1xf32>
    %11 = arith.subf %9, %10 : vector<16x1xf32>
    %cst_4 = arith.constant 0.000000e+00 : f32
    %12 = vector.broadcast %cst_4 : f32 to vector<16x1xf32>
    %13 = arith.maximumf %11, %12 : vector<16x1xf32>
    %cst_5 = arith.constant 1.00787401 : f32
    %14 = vector.broadcast %cst_5 : f32 to vector<16x1xf32>
    %15 = arith.mulf %13, %14 : vector<16x1xf32>
    %16 = math.sqrt %15 : vector<16x1xf32>
    %c0_6 = arith.constant 0 : index
    %c0_7 = arith.constant 0 : index
    %17 = memref.load %arg5[%c0_6, %c0_7] : memref<1x2xf32, #tpu.memory_space<smem>>
    %c0_8 = arith.constant 0 : index
    %c1 = arith.constant 1 : index
    %18 = memref.load %arg5[%c0_8, %c1] : memref<1x2xf32, #tpu.memory_space<smem>>
    %cst_9 = arith.constant 9.99999997E-7 : f32
    %19 = vector.broadcast %cst_9 : f32 to vector<16x1xf32>
    %20 = arith.addf %16, %19 : vector<16x1xf32>
    %cst_10 = arith.constant 1.000000e+00 : f32
    %21 = vector.broadcast %cst_10 : f32 to vector<16x1xf32>
    %22 = arith.divf %21, %20 : vector<16x1xf32>
    %23 = vector.broadcast %17 : f32 to vector<16x1xf32>
    %24 = arith.mulf %23, %22 : vector<16x1xf32>
    %25 = vector.broadcast %7 : vector<16x1xf32> to vector<16x128xf32>
    %26 = arith.subf %0, %25 : vector<16x128xf32>
    %27 = vector.broadcast %24 : vector<16x1xf32> to vector<16x128xf32>
    %28 = arith.mulf %27, %26 : vector<16x128xf32>
    %29 = vector.broadcast %18 : f32 to vector<16x128xf32>
    %30 = arith.addf %28, %29 : vector<16x128xf32>
    %31 = arith.truncf %30 : vector<16x128xf32> to vector<16x128xbf16>
    %c0_11 = arith.constant 0 : index
    %c0_12 = arith.constant 0 : index
    %32 = vector.load %arg3[%c0_11, %c0_12] : memref<128x128xbf16, #tpu.memory_space<vmem>>, vector<128x128xbf16>
    %cst_13 = arith.constant dense<0.000000e+00> : vector<16x128xf32>
    %33 = tpu.matmul %31, %32, %cst_13 {dimension_numbers = #tpu.dot_dimension_numbers<[1], [0], [0], [1], [0, 0, 1, 1], [], []>} : vector<16x128xbf16>, vector<128x128xbf16>, vector<16x128xf32> -> vector<16x128xf32>
    %c0_14 = arith.constant 0 : index
    %c0_15 = arith.constant 0 : index
    %34 = vector.load %arg4[%c0_14, %c0_15] : memref<1x128xf32, #tpu.memory_space<vmem>>, vector<1x128xf32>
    %35 = vector.broadcast %34 : vector<1x128xf32> to vector<16x128xf32>
    %36 = arith.addf %33, %35 : vector<16x128xf32>
    %37 = arith.addf %0, %36 : vector<16x128xf32>
    %c0_16 = arith.constant 0 : index
    %c0_17 = arith.constant 0 : index
    %38 = vector.load %arg6[%c0_16, %c0_17] : memref<16x128xf32, #tpu.memory_space<vmem>>, vector<16x128xf32>
    tpu.vector_store %arg6[%c0_16, %c0_17], %37 {strides = array<i32>} : memref<16x128xf32, #tpu.memory_space<vmem>>, vector<16x128xf32>,
    return
  }
  func.func @transform_0(%arg0: i32, %arg1: memref<1xi32, #tpu.memory_space<smem>>) -> (i32, i32) {
    %c0_i32 = arith.constant 0 : i32
    %c0_i32_0 = arith.constant 0 : i32
    return %arg0, %c0_i32 : i32, i32
  }
  func.func @transform_1(%arg0: i32, %arg1: memref<1xi32, #tpu.memory_space<smem>>) -> (i32, i32) {
    %c0_i32 = arith.constant 0 : i32
    %c0_i32_0 = arith.constant 0 : i32
    %c0_i32_1 = arith.constant 0 : i32
    return %c0_i32, %c0_i32_0 : i32, i32
  }
  func.func @transform_2(%arg0: i32, %arg1: memref<1xi32, #tpu.memory_space<smem>>) -> (i32, i32) {
    %c0_i32 = arith.constant 0 : i32
    %c0_i32_0 = arith.constant 0 : i32
    %c0_i32_1 = arith.constant 0 : i32
    return %c0_i32, %c0_i32_0 : i32, i32
  }
  func.func @transform_3(%arg0: i32, %arg1: memref<1xi32, #tpu.memory_space<smem>>) -> (i32, i32) {
    %c0_i32 = arith.constant 0 : i32
    %c0_i32_0 = arith.constant 0 : i32
    %c0_i32_1 = arith.constant 0 : i32
    return %c0_i32, %c0_i32_0 : i32, i32
  }
  func.func @transform_4(%arg0: i32, %arg1: memref<1xi32, #tpu.memory_space<smem>>) -> (i32, i32) {
    %c0_i32 = arith.constant 0 : i32
    %c0_i32_0 = arith.constant 0 : i32
    return %arg0, %c0_i32 : i32, i32
  }
}

</mosaic_0001>

<bundles_post_ra>
// kernel: tpu_custom_call.1
= control target key start
LH: loop header
LB: loop body
LE: loop exit
PB: predicated region body
PF: predicated region fallthrough
CT: control target
= control target key end

     0   :  { %11 = vsyncpa [#allocation5], 0  ;;  %s501_s0 = inlined_call_operand.<no memory space> [shape: s32[1], index: 0, kind: input, shape index: {}]   ;;  %s502_s1 = inlined_call_operand.hbm [shape: f32[16,128], index: 1, kind: input, shape index: {}]   ;;  %s503_s2 = inlined_call_operand.hbm [shape: bf16[128,128], index: 2, kind: input, shape index: {}]   ;;  %s504_s3 = inlined_call_operand.vmem [shape: f32[1,128], index: 3, kind: input, shape index: {}]   ;;  %s505_s4 = inlined_call_operand.vmem [shape: f32[1,2], index: 4, kind: input, shape index: {}]   ;;  %s506_s5 = inlined_call_operand.hbm [shape: f32[16,128], index: 5, kind: output, shape index: {}]  }
   0x1   :  { %12 = vsyncpa [#allocation9], 0 }
   0x2   :  { %13 = vsyncpa [#allocation7], 0 }
   0x3   :  { %14 = vsyncpa [#allocation6], 0  ;;  %s19_s19 = sshll.u32 %s502_s1, 4  ;;  %s415_s20 = smov [#allocation4]   ;;  %s20_s19 = int_to_ptr.hbm [resolvable:$true] %s19_s19 }
   0x4   :  { %s21_s21 = sshll.u32 %s415_s20, 4  ;;  %s32_s24 = sshll.u32 %s503_s2, 4  ;;  %s22_s21 = int_to_ptr.vmem [resolvable:$true] %s21_s21  ;;  %s33_s24 = int_to_ptr.hbm [resolvable:$true] %s32_s24 }
   0x5   :  { %s416_s25 = smov 128   ;;  %s417_s26 = smov 8  }
   0x6   :  { %27 = dma.hbm_to_vmem [thread:$0]  %s20_s19, 256, %s22_s21, [#allocation5], %s416_s25, %s416_s25, %s417_s26  }
   0x7   :  { %s418_s27 = smov [#allocation8]   ;;  %s419_s29 = smov 64  }
   0x8   :  { %s34_s28 = sshll.u32 %s418_s27, 4  ;;  %s420_s1 = smov 4   ;;  %s35_s28 = int_to_ptr.vmem [resolvable:$true] %s34_s28 }
   0x9   :  { %40 = dma.hbm_to_vmem [thread:$0]  %s33_s24, 1024, %s35_s28, [#allocation9], %s419_s29, %s419_s29, %s420_s1  }
   0xa   :  { %s48_s7 = sshll.u32 %s505_s4, 4  ;;  %s421_s8 = smov [#allocation10]   ;;  %s49_s7 = int_to_ptr.vmem [resolvable:$true] %s48_s7 }
   0xb   :  { %51 = dma.vmem_to_smem %s49_s7, 16, %s421_s8, [#allocation7]  }
   0xc   :  { %407 = dma.done.wait [#allocation5], 256  }
   0xd   :  { %408 = vsyncadd [#allocation5], 4294967040 }
   0xe   :  { %409 = dma.done.wait [#allocation9], 1024  }
   0xf   :  { %410 = vsyncadd [#allocation9], 4294966272 }
  0x10   :  { %411 = dma.done.wait [#allocation7], 16  }
  0x11   :  { %412 = vsyncadd [#allocation7], 4294967280 }
  0x12   :  { %64 = sfence }
  0x13   :  { %v465_v0 = vld [vmem:[#allocation4] sm:$0xff]  ;;  %v470_v2 = vld [vmem:[#allocation4 + $0x8] sm:$0xff]  ;;  %v303_v16 = vld [vmem:[#allocation8 + $0x28] sm:$0xff]  ;;  %s483_s2 = sld [smem:[#allocation10]]  ;;  %s422_s11 = smov [#allocation11]  }
  0x14   :  { %67 = vadd.xlane.f32.xlu0 %v465_v0  ;;  %v71_v1 = vmul.f32 %v465_v0, %v465_v0  ;;  %v72_v3 = vmul.f32 %v470_v2, %v470_v2  ;;  %v305_v9 = vld [vmem:[#allocation8 + $0x38] sm:$0xff]  ;;  %v304_v11 = vld [vmem:[#allocation8 + $0x30] sm:$0xff]  ;;  %v302_v20 = vld [vmem:[#allocation8 + $0x20] sm:$0xff]  ;;  %s265_s4 = sld [smem:[#allocation10 + $0x1]]  ;;  %s248_s12 = sshll.u32 %s422_s11, 4  ;;  %s249_s12 = int_to_ptr.vmem [resolvable:$true] %s248_s12 }
  0x15   :  { %226 = vmatpush.bf16.msra.mxu0 %v305_v9  ;;  %v301_v24 = vld [vmem:[#allocation8 + $0x18] sm:$0xff]  ;;  %v300_v28 = vld [vmem:[#allocation8 + $0x10] sm:$0xff]  ;;  %v299_v31 = vld [vmem:[#allocation8 + $0x8] sm:$0xff]  ;;  %s250_s15 = sshll.u32 %s506_s5, 4  ;;  %s251_s15 = int_to_ptr.hbm [resolvable:$true] %s250_s15 }
  0x16   :  { %73 = vadd.xlane.f32.xlu1 %v71_v1  ;;  %v298_v38 = vld [vmem:[#allocation8] sm:$0xff] }
  0x19   :  { %227 = vmatpush.bf16.msra.mxu0 %v304_v11  ;;  %v147_v1 = vstv %s483_s2 }
  0x1c   :  { %69 = vadd.xlane.f32.xlu0 %v470_v2 }
  0x1d   :  { %228 = vmatpush.bf16.msra.mxu0 %v303_v16  ;;  %v154_v16 = vstv %s265_s4 }
  0x1e   :  { %75 = vadd.xlane.f32.xlu1 %v72_v3 }
  0x21   :  { %229 = vmatpush.bf16.msra.mxu0 %v302_v20 }
  0x25   :  { %230 = vmatpush.bf16.msra.mxu0 %v301_v24 }
  0x29   :  { %231 = vmatpush.bf16.msra.mxu0 %v300_v28 }
  0x2d   :  { %232 = vmatpush.bf16.msra.mxu0 %v299_v31 }
  0x31   :  { %233 = vmatpush.bf16.msra.mxu0 %v298_v38 }
  0x87   :  { %v68_v4 = vpop.xlane.xlu0 %67 }
  0x88   :  { %v475_v5 = vmul.f32 0.0078125, %v68_v4 }
  0x89   :  { %v74_v6 = vpop.xlane.xlu1 %73 }
  0x8a   :  { %v81_v7 = vmul.f32 %v475_v5, %v475_v5  ;;  %v79_v8 = vmul.f32 0.0078125, %v74_v6  ;;  %v150_v9 = vsub.f32 %v465_v0, %v475_v5 }
  0x8c   :  { %v83_v10 = vsub.f32 %v79_v8, %v81_v7 }
  0x8e   :  { %v85_v12 = vmax.f32 %v83_v10, 0.0 }
  0x8f   :  { %v70_v13 = vpop.xlane.xlu0 %69 }
  0x90   :  { %v87_v14 = vmul.f32 1.007874, %v85_v12  ;;  %v479_v15 = vmul.f32 0.0078125, %v70_v13 }
  0x91   :  { %v76_v17 = vpop.xlane.xlu1 %75 }
  0x92   :  { %315 = vrsqrt.f32 %v87_v14  ;;  %v82_v18 = vmul.f32 %v479_v15, %v479_v15  ;;  %v80_v19 = vmul.f32 0.0078125, %v76_v17  ;;  %vm96_vm0 = vcmp.eq.f32.partialorder %v87_v14, inf }
  0x93   :  { %v99_v36 = vand.u32 2147483648, %v87_v14  ;;  %vm98_vm1 = vcmp.eq.f32.partialorder %v87_v14, 0.0  ;;  %v151_v12 = vsub.f32 %v470_v2, %v479_v15 }
  0x94   :  { %v84_v21 = vsub.f32 %v80_v19, %v82_v18 }
  0x96   :  { %v86_v22 = vmax.f32 %v84_v21, 0.0  ;;  %v314_v21 = vld [vmem:[%s504_s3] ss:$0 sm:$0xff] }
  0x98   :  { %v316_v23 = vpop.eup %315  ;;  %v88_v26 = vmul.f32 1.007874, %v86_v22 }
  0x99   :  { %v90_v25 = vmul.f32 %v316_v23, %v87_v14 }
  0x9a   :  { %317 = vrsqrt.f32 %v88_v26  ;;  %vm108_vm2 = vcmp.eq.f32.partialorder %v88_v26, inf  ;;  %v111_v46 = vand.u32 2147483648, %v88_v26  ;;  %vm110_vm3 = vcmp.eq.f32.partialorder %v88_v26, 0.0 }
  0x9b   :  { %v91_v27 = vmul.f32 %v316_v23, %v90_v25 }
  0x9d   :  { %v92_v29 = vmul.f32 0.5, %v91_v27 }
  0x9f   :  { %v93_v30 = vsub.f32 1.5, %v92_v29 }
  0xa0   :  { %v318_v32 = vpop.eup %317 }
  0xa1   :  { %v94_v33 = vmul.f32 %v316_v23, %v93_v30  ;;  %v102_v34 = vmul.f32 %v318_v32, %v88_v26 }
  0xa3   :  { %v95_v35 = vmul.f32 %v94_v33, %v87_v14  ;;  %v103_v37 = vmul.f32 %v318_v32, %v102_v34 }
  0xa5   :  { %v97_v39 = vsel %vm96_vm0, %v87_v14, %v95_v35  ;;  %v104_v40 = vmul.f32 0.5, %v103_v37 }
  0xa6   :  { %v100_v41 = vsel %vm98_vm1, %v99_v36, %v97_v39 }
  0xa7   :  { %v115_v42 = vadd.f32 1e-06, %v100_v41  ;;  %v105_v43 = vsub.f32 1.5, %v104_v40 }
  0xa9   :  { %319 = vrcp.f32 %v115_v42  ;;  %v106_v44 = vmul.f32 %v318_v32, %v105_v43  ;;  %v128_v55 = vand.u32 2147483648, %v115_v42  ;;  %vm122_vm5 = vweird.f32 %v115_v42 }
  0xaa   :  { %v126_v56 = vand.u32 2147483647, %v115_v42 }
  0xab   :  { %v107_v45 = vmul.f32 %v106_v44, %v88_v26  ;;  %v129_v60 = vor.u32 1.1754944e-38, %v128_v55 }
  0xac   :  { %vm127_vm7 = vcmp.eq.f32.partialorder %v126_v56, 8.507059e+37 }
  0xad   :  { %v109_v47 = vsel %vm108_vm2, %v88_v26, %v107_v45 }
  0xae   :  { %v112_v49 = vsel %vm110_vm3, %v111_v46, %v109_v47 }
  0xaf   :  { %v320_v48 = vpop.eup %319  ;;  %v116_v50 = vadd.f32 1e-06, %v112_v49 }
  0xb0   :  { %v118_v51 = vmul.f32 %v320_v48, %v115_v42  ;;  %vm123_vm4 = vweird.f32 %v320_v48 }
  0xb1   :  { %321 = vrcp.f32 %v116_v50  ;;  %vm124_vm6 = vmor %vm122_vm5, %vm123_vm4  ;;  %v143_v63 = vand.u32 2147483648, %v116_v50  ;;  %v141_v4 = vand.u32 2147483647, %v116_v50  ;;  %vm137_vm9 = vweird.f32 %v116_v50 }
  0xb2   :  { %v119_v52 = vsub.f32 1.0, %v118_v51 }
  0xb3   :  { %v144_v8 = vor.u32 1.1754944e-38, %v143_v63  ;;  %vm142_vm11 = vcmp.eq.f32.partialorder %v141_v4, 8.507059e+37 }
  0xb4   :  { %v120_v53 = vmul.f32 %v320_v48, %v119_v52 }
  0xb6   :  { %v121_v54 = vadd.f32 %v320_v48, %v120_v53 }
  0xb7   :  { %v322_v57 = vpop.eup %321 }
  0xb8   :  { %v125_v58 = vsel %vm124_vm6, %v320_v48, %v121_v54  ;;  %v133_v59 = vmul.f32 %v322_v57, %v116_v50  ;;  %vm138_vm8 = vweird.f32 %v322_v57 }
  0xb9   :  { %v130_v62 = vsel %vm127_vm7, %v129_v60, %v125_v58  ;;  %vm139_vm10 = vmor %vm137_vm9, %vm138_vm8 }
  0xba   :  { %v134_v61 = vsub.f32 1.0, %v133_v59  ;;  %v148_v7 = vmul.f32 %v147_v1, %v130_v62 }
  0xbc   :  { %v135_v3 = vmul.f32 %v322_v57, %v134_v61  ;;  %v152_v14 = vmul.f32 %v150_v9, %v148_v7 }
  0xbe   :  { %v136_v6 = vadd.f32 %v322_v57, %v135_v3  ;;  %v155_v18 = vadd.f32 %v154_v16, %v152_v14 }
  0xc0   :  { %v140_v10 = vsel %vm139_vm10, %v322_v57, %v136_v6 }
  0xc1   :  { %v145_v11 = vsel %vm142_vm11, %v144_v8, %v140_v10 }
  0xc2   :  { %v149_v13 = vmul.f32 %v147_v1, %v145_v11 }
  0xc4   :  { %v153_v17 = vmul.f32 %v151_v12, %v149_v13 }
  0xc6   :  { %v156_v19 = vadd.f32 %v154_v16, %v153_v17 }
  0xc8   :  { %v157_v20 = vpack.c.bf16 %v156_v19, %v155_v18 }
  0xca   :  { %234 = vmatmul.bf16.vlgmr.msra.gmra.mxu0 %v157_v20 }
 0x147   :  { %v235_v22 = vpop.f32.mrf.mxu0 }
 0x148   :  { %v236_v5 = vadd.f32 %v314_v21, %v235_v22 }
 0x14a   :  { %v240_v23 = vadd.f32 %v236_v5, %v465_v0 }
 0x14c   :  { %242 = vst [vmem:[#allocation11] sm:$0xff] %v240_v23 }
 0x14f   :  { %v237_v24 = vpop.f32.mrf.mxu0 }
 0x150   :  { %v238_v15 = vadd.f32 %v314_v21, %v237_v24 }
 0x152   :  { %v241_v25 = vadd.f32 %v238_v15, %v470_v2 }
 0x154   :  { %243 = vst [vmem:[#allocation11 + $0x8] sm:$0xff] %v241_v25 }
 0x155   :  { %256 = dma.vmem_to_hbm [thread:$0]  %s249_s12, 256, %s251_s15, [#allocation6], %s416_s25, %s416_s25, %s417_s26  }
 0x156   :  { %413 = dma.done.wait [#allocation6], 256  }
 0x157   :  { %414 = vsyncadd [#allocation6], 4294967040 }
 0x158   :  { %261 = vsyncpa [#allocation5], 1 }
 0x159   :  { %262 = vsyncpa [#allocation9], 1 }
 0x15a   :  { %263 = vsyncpa [#allocation6], 1 }
 0x15b   :  { %264 = vsyncpa [#allocation7], 1 }

</bundles_post_ra>
